<compile_context>
chip_gen: v6e
topology: v6e:2x2x1
jax: 0.10.0
libtpu: 0.0.40
codegen_flags: <defaults>
</compile_context>

<pallas_src>
import functools

import jax
import jax.numpy as jnp
from jax.experimental import pallas as pl
from jax.experimental.pallas import tpu as pltpu


def _mlp_kernel(x_ref, w1_ref, b1_ref, w2_ref, b2_ref, w3_ref, b3_ref, o_ref):
    # Feature-major / batch-on-lanes: activations are (features, TB) so the
    # 128-wide lane axis is the dense batch axis (lane-dense loads/stores).
    x = x_ref[...]                                            # (4, TB) bf16

    # fc1 + ReLU: (32,4)bf16 @ (4,TB)bf16 -> (32,TB) f32 accumulate on MXU.
    h1 = jnp.dot(w1_ref[...], x, preferred_element_type=jnp.float32)
    h1 = jnp.maximum(h1 + b1_ref[...], 0.0)                   # f32 VPU epilogue

    # fc2 + ReLU
    h2 = jnp.dot(w2_ref[...], h1.astype(jnp.bfloat16),
                 preferred_element_type=jnp.float32)
    h2 = jnp.maximum(h2 + b2_ref[...], 0.0)                   # (32, TB)

    # fc3 + sigmoid
    logits = jnp.dot(w3_ref[...], h2.astype(jnp.bfloat16),
                     preferred_element_type=jnp.float32)
    logits = logits + b3_ref[...]                             # (3, TB)

    o_ref[...] = jax.nn.sigmoid(logits).astype(o_ref.dtype)


def _default_batch_tile() -> int:
    """Generation-tuned batch tile: per-step bytes must dwarf ~0.35us/step."""
    try:
        kind = jax.devices()[0].device_kind.lower()
    except Exception:
        kind = ""
    if "v5e" in kind or "v5 lite" in kind or "v5litepod" in kind:
        return 8192        # ~0.8 TB/s HBM
    if "v7" in kind:
        return 32768       # ~3.2 TB/s HBM, 64 MiB VMEM -> cap at 32K
    return 16384           # v6e (and unknown): ~1.4 TB/s HBM


@functools.partial(jax.jit, static_argnames=("tb", "out_bf16"))
def net_forward(x, params, *, tb=None, out_bf16=False):
    """x: (B, 4) float32 -> (B, 3) float32. params: PyTorch-layout weights."""
    B, in_dim = x.shape
    hid = params["w1"].shape[0]
    out_dim = params["w3"].shape[0]

    if tb is None:
        tb = _default_batch_tile()

    # Batch tile: multiple of 128 (lane width), clamped to the padded batch.
    tb = max(128, (int(tb) // 128) * 128)
    bp_min = pl.cdiv(B, 128) * 128
    if bp_min >= 2 * 128:
        # Keep >= 2 grid steps so v7x's two TensorCores both get work from the
        # "parallel" batch axis (near-free on single-TC v5e/v6e).
        tb = min(tb, pl.cdiv(bp_min, 2 * 128) * 128)
    tb = min(tb, bp_min)
    bp = pl.cdiv(B, tb) * tb                    # padded batch, divisible by tb

    # Batch-on-lanes, bf16 in one pass: (B,4) f32 -> (4, Bp) bf16. The
    # convert+transpose+pad fuse into a single XLA copy, and allow_input_fusion
    # lets XLA pull that copy into the pallas_call (no extra HBM intermediate).
    x_t = jnp.pad(x.astype(jnp.bfloat16).T, ((0, 0), (0, bp - B)))

    # Weights stay (out, in) like PyTorch; cast to bf16 once for the MXU.
    w1 = params["w1"].astype(jnp.bfloat16)      # (32, 4)
    w2 = params["w2"].astype(jnp.bfloat16)      # (32, 32)
    w3 = params["w3"].astype(jnp.bfloat16)      # (3, 32)
    b1, b2, b3 = params["b1"], params["b2"], params["b3"]   # (out, 1) f32

    full = lambda a: pl.BlockSpec(a.shape, lambda i: (0,) * a.ndim)

    out_dtype = jnp.bfloat16 if out_bf16 else jnp.float32
    flops = 2 * bp * (in_dim * hid + hid * hid + hid * out_dim)
    bytes_accessed = int(
        2 * bp * in_dim                                       # bf16 x stream
        + jnp.dtype(out_dtype).itemsize * bp * out_dim        # output stream
        + 2 * (w1.size + w2.size + w3.size)                   # bf16 weights
        + 4 * (b1.size + b2.size + b3.size))                  # f32 biases

    # Explicit scoped-VMEM budget with headroom (covers the f32 intermediates
    # plus double-buffered x/out tiles); capped well under v7x's 64 MiB.
    vmem_limit = int(min(40 << 20, max(16 << 20, 1024 * tb)))

    out_t = pl.pallas_call(
        _mlp_kernel,
        out_shape=jax.ShapeDtypeStruct((out_dim, bp), out_dtype),
        grid=(bp // tb,),
        in_specs=[
            pl.BlockSpec((in_dim, tb), lambda i: (0, i)),     # x tile (bf16)
            full(w1), full(b1), full(w2), full(b2), full(w3), full(b3),
        ],
        out_specs=pl.BlockSpec((out_dim, tb), lambda i: (0, i)),  # lane-dense
        compiler_params=pltpu.CompilerParams(
            dimension_semantics=("parallel",),                # megacore on v7x
            allow_input_fusion=[True, False, False, False, False, False, False],
            vmem_limit_bytes=vmem_limit),
        cost_estimate=pl.CostEstimate(
            flops=flops,
            transcendentals=bp * out_dim,                     # sigmoid exp
            bytes_accessed=bytes_accessed),
    )(x_t, w1, b1, w2, b2, w3, b3)

    # Back to (B, 3). Lane-dense (3, Bp) output is kept per perf review; the
    # final transpose of the tiny 3-wide result stays in the wrapper.
    return out_t[:, :B].T.astype(jnp.float32)


def init_params(key):
    """PyTorch-style shapes: Linear weight (out, in), bias kept 2-D (out, 1)."""
    k1, k2, k3, k4, k5, k6 = jax.random.split(key, 6)

    def uniform_init(k, shape, fan_in):
        bound = 1.0 / jnp.sqrt(jnp.float32(fan_in))
        return jax.random.uniform(k, shape, jnp.float32, -bound, bound)

    return {
        "w1": uniform_init(k1, (32, 4), 4),
        "b1": uniform_init(k2, (32, 1), 4),
        "w2": uniform_init(k3, (32, 32), 32),
        "b2": uniform_init(k4, (32, 1), 32),
        "w3": uniform_init(k5, (3, 32), 32),
        "b3": uniform_init(k6, (3, 1), 32),
    }


def _reference_forward_f32(x, params):
    """Plain-JAX f32 reference mirroring the PyTorch forward."""
    h1 = jnp.maximum(x @ params["w1"].T + params["b1"].T, 0.0)
    h2 = jnp.maximum(h1 @ params["w2"].T + params["b2"].T, 0.0)
    return jax.nn.sigmoid(h2 @ params["w3"].T + params["b3"].T)


def _reference_forward_matched(x, params):
    """Plain-JAX reference with the SAME bf16-dot / f32-accumulate math."""
    xt = x.astype(jnp.bfloat16).T
    w1 = params["w1"].astype(jnp.bfloat16)
    w2 = params["w2"].astype(jnp.bfloat16)
    w3 = params["w3"].astype(jnp.bfloat16)
    h1 = jnp.maximum(
        jnp.dot(w1, xt, preferred_element_type=jnp.float32) + params["b1"], 0.0)
    h2 = jnp.maximum(
        jnp.dot(w2, h1.astype(jnp.bfloat16),
                preferred_element_type=jnp.float32) + params["b2"], 0.0)
    logits = jnp.dot(w3, h2.astype(jnp.bfloat16),
                     preferred_element_type=jnp.float32) + params["b3"]
    return jax.nn.sigmoid(logits).T


if __name__ == "__main__":
    key = jax.random.PRNGKey(0)
    k_params, k_x, k_x2 = jax.random.split(key, 3)

    params = init_params(k_params)

    # Small deterministic check: batch=8, features=4*1.
    x = jax.random.normal(k_x, (8, 4), dtype=jnp.float32)
    out = jax.block_until_ready(net_forward(x, params))
    assert out.shape == (8, 3), out.shape
    assert jnp.allclose(out, _reference_forward_matched(x, params),
                        atol=1e-4, rtol=1e-4), "mismatch vs bf16-matched reference"
    assert jnp.allclose(out, _reference_forward_f32(x, params),
                        atol=2e-2, rtol=2e-2), "mismatch vs f32 reference"

    # Exercise batch padding plus a multi-step (pipelined / megacore) grid.
    x2 = jax.random.normal(k_x2, (300, 4), dtype=jnp.float32)
    out2 = jax.block_until_ready(net_forward(x2, params))
    assert out2.shape == (300, 3), out2.shape
    assert jnp.allclose(out2, _reference_forward_matched(x2, params),
                        atol=1e-4, rtol=1e-4), "mismatch vs bf16-matched reference (B=300)"

    print("KERNEL_OK")
</pallas_src>

<mosaic_0001>
module attributes {stable_mosaic.version = 11 : i64} {
  func.func @_mlp_kernel(%arg0: i32, %arg1: memref<4x128xbf16, #tpu.memory_space<vmem>>, %arg2: memref<32x4xbf16, #tpu.memory_space<vmem>>, %arg3: memref<32x1xf32, #tpu.memory_space<vmem>>, %arg4: memref<32x32xbf16, #tpu.memory_space<vmem>>, %arg5: memref<32x1xf32, #tpu.memory_space<vmem>>, %arg6: memref<3x32xbf16, #tpu.memory_space<vmem>>, %arg7: memref<3x1xf32, #tpu.memory_space<vmem>>, %arg8: memref<3x128xf32, #tpu.memory_space<vmem>>) attributes {dimension_semantics = [#tpu.dimension_semantics<parallel>], iteration_bounds = array<i64: 1>, scalar_prefetch = 0 : i64, scratch_operands = 0 : i64, tpu.core_type = #tpu.core_type<tc>, window_params = [{transform_indices = @transform_0, window_bounds = array<i64: 4, 128>}, {pipeline_mode = #tpu.pipeline_mode<synchronous>, transform_indices = @transform_1, window_bounds = array<i64: 32, 4>}, {pipeline_mode = #tpu.pipeline_mode<synchronous>, transform_indices = @transform_2, window_bounds = array<i64: 32, 1>}, {pipeline_mode = #tpu.pipeline_mode<synchronous>, transform_indices = @transform_3, window_bounds = array<i64: 32, 32>}, {pipeline_mode = #tpu.pipeline_mode<synchronous>, transform_indices = @transform_4, window_bounds = array<i64: 32, 1>}, {pipeline_mode = #tpu.pipeline_mode<synchronous>, transform_indices = @transform_5, window_bounds = array<i64: 3, 32>}, {pipeline_mode = #tpu.pipeline_mode<synchronous>, transform_indices = @transform_6, window_bounds = array<i64: 3, 1>}, {transform_indices = @transform_7, window_bounds = array<i64: 3, 128>}]} {
    %c0 = arith.constant 0 : index
    %c0_0 = arith.constant 0 : index
    %0 = vector.load %arg1[%c0, %c0_0] : memref<4x128xbf16, #tpu.memory_space<vmem>>, vector<4x128xbf16>
    %c0_1 = arith.constant 0 : index
    %c0_2 = arith.constant 0 : index
    %1 = vector.load %arg2[%c0_1, %c0_2] : memref<32x4xbf16, #tpu.memory_space<vmem>>, vector<32x4xbf16>
    %cst = arith.constant dense<0.000000e+00> : vector<32x128xf32>
    %2 = tpu.matmul %1, %0, %cst {dimension_numbers = #tpu.dot_dimension_numbers<[1], [0], [0], [1], [0, 0, 1, 1], [], []>} : vector<32x4xbf16>, vector<4x128xbf16>, vector<32x128xf32> -> vector<32x128xf32>
    %c0_3 = arith.constant 0 : index
    %c0_4 = arith.constant 0 : index
    %3 = vector.load %arg3[%c0_3, %c0_4] : memref<32x1xf32, #tpu.memory_space<vmem>>, vector<32x1xf32>
    %4 = vector.broadcast %3 : vector<32x1xf32> to vector<32x128xf32>
    %5 = arith.addf %2, %4 : vector<32x128xf32>
    %cst_5 = arith.constant 0.000000e+00 : f32
    %6 = vector.broadcast %cst_5 : f32 to vector<32x128xf32>
    %7 = arith.maximumf %5, %6 : vector<32x128xf32>
    %c0_6 = arith.constant 0 : index
    %c0_7 = arith.constant 0 : index
    %8 = vector.load %arg4[%c0_6, %c0_7] : memref<32x32xbf16, #tpu.memory_space<vmem>>, vector<32x32xbf16>
    %9 = arith.truncf %7 : vector<32x128xf32> to vector<32x128xbf16>
    %cst_8 = arith.constant dense<0.000000e+00> : vector<32x128xf32>
    %10 = tpu.matmul %8, %9, %cst_8 {dimension_numbers = #tpu.dot_dimension_numbers<[1], [0], [0], [1], [0, 0, 1, 1], [], []>} : vector<32x32xbf16>, vector<32x128xbf16>, vector<32x128xf32> -> vector<32x128xf32>
    %c0_9 = arith.constant 0 : index
    %c0_10 = arith.constant 0 : index
    %11 = vector.load %arg5[%c0_9, %c0_10] : memref<32x1xf32, #tpu.memory_space<vmem>>, vector<32x1xf32>
    %12 = vector.broadcast %11 : vector<32x1xf32> to vector<32x128xf32>
    %13 = arith.addf %10, %12 : vector<32x128xf32>
    %cst_11 = arith.constant 0.000000e+00 : f32
    %14 = vector.broadcast %cst_11 : f32 to vector<32x128xf32>
    %15 = arith.maximumf %13, %14 : vector<32x128xf32>
    %c0_12 = arith.constant 0 : index
    %c0_13 = arith.constant 0 : index
    %16 = vector.load %arg6[%c0_12, %c0_13] : memref<3x32xbf16, #tpu.memory_space<vmem>>, vector<3x32xbf16>
    %17 = arith.truncf %15 : vector<32x128xf32> to vector<32x128xbf16>
    %cst_14 = arith.constant dense<0.000000e+00> : vector<3x128xf32>
    %18 = tpu.matmul %16, %17, %cst_14 {dimension_numbers = #tpu.dot_dimension_numbers<[1], [0], [0], [1], [0, 0, 1, 1], [], []>} : vector<3x32xbf16>, vector<32x128xbf16>, vector<3x128xf32> -> vector<3x128xf32>
    %c0_15 = arith.constant 0 : index
    %c0_16 = arith.constant 0 : index
    %19 = vector.load %arg7[%c0_15, %c0_16] : memref<3x1xf32, #tpu.memory_space<vmem>>, vector<3x1xf32>
    %20 = vector.broadcast %19 : vector<3x1xf32> to vector<3x128xf32>
    %21 = arith.addf %18, %20 : vector<3x128xf32>
    %22 = arith.negf %21 : vector<3x128xf32>
    %23 = math.exp %22 : vector<3x128xf32>
    %cst_17 = arith.constant 1.000000e+00 : f32
    %24 = vector.broadcast %cst_17 : f32 to vector<3x128xf32>
    %25 = arith.addf %24, %23 : vector<3x128xf32>
    %26 = arith.divf %24, %25 : vector<3x128xf32>
    %c0_18 = arith.constant 0 : index
    %c0_19 = arith.constant 0 : index
    %27 = vector.load %arg8[%c0_18, %c0_19] : memref<3x128xf32, #tpu.memory_space<vmem>>, vector<3x128xf32>
    tpu.vector_store %arg8[%c0_18, %c0_19], %26 {strides = array<i32>} : memref<3x128xf32, #tpu.memory_space<vmem>>, vector<3x128xf32>,
    return
  }
  func.func @transform_0(%arg0: i32) -> (i32, i32) {
    %c0_i32 = arith.constant 0 : i32
    %c0_i32_0 = arith.constant 0 : i32
    return %c0_i32, %arg0 : i32, i32
  }
  func.func @transform_1(%arg0: i32) -> (i32, i32) {
    %c0_i32 = arith.constant 0 : i32
    %c0_i32_0 = arith.constant 0 : i32
    %c0_i32_1 = arith.constant 0 : i32
    return %c0_i32, %c0_i32_0 : i32, i32
  }
  func.func @transform_2(%arg0: i32) -> (i32, i32) {
    %c0_i32 = arith.constant 0 : i32
    %c0_i32_0 = arith.constant 0 : i32
    %c0_i32_1 = arith.constant 0 : i32
    return %c0_i32, %c0_i32_0 : i32, i32
  }
  func.func @transform_3(%arg0: i32) -> (i32, i32) {
    %c0_i32 = arith.constant 0 : i32
    %c0_i32_0 = arith.constant 0 : i32
    %c0_i32_1 = arith.constant 0 : i32
    return %c0_i32, %c0_i32_0 : i32, i32
  }
  func.func @transform_4(%arg0: i32) -> (i32, i32) {
    %c0_i32 = arith.constant 0 : i32
    %c0_i32_0 = arith.constant 0 : i32
    %c0_i32_1 = arith.constant 0 : i32
    return %c0_i32, %c0_i32_0 : i32, i32
  }
  func.func @transform_5(%arg0: i32) -> (i32, i32) {
    %c0_i32 = arith.constant 0 : i32
    %c0_i32_0 = arith.constant 0 : i32
    %c0_i32_1 = arith.constant 0 : i32
    return %c0_i32, %c0_i32_0 : i32, i32
  }
  func.func @transform_6(%arg0: i32) -> (i32, i32) {
    %c0_i32 = arith.constant 0 : i32
    %c0_i32_0 = arith.constant 0 : i32
    %c0_i32_1 = arith.constant 0 : i32
    return %c0_i32, %c0_i32_0 : i32, i32
  }
  func.func @transform_7(%arg0: i32) -> (i32, i32) {
    %c0_i32 = arith.constant 0 : i32
    %c0_i32_0 = arith.constant 0 : i32
    return %c0_i32, %arg0 : i32, i32
  }
}

</mosaic_0001>

<bundles_post_ra>
// kernel: net_forward.2
= control target key start
LH: loop header
LB: loop body
LE: loop exit
PB: predicated region body
PF: predicated region fallthrough
CT: control target
= control target key end

     0   :  { %s486_s0 = inlined_call_operand.vmem [shape: bf16[32,4], index: 0, kind: input, shape index: {}]   ;;  %s487_s1 = inlined_call_operand.vmem [shape: f32[32,1], index: 1, kind: input, shape index: {}]   ;;  %s488_s2 = inlined_call_operand.vmem [shape: bf16[32,32], index: 2, kind: input, shape index: {}]   ;;  %s489_s3 = inlined_call_operand.vmem [shape: f32[32,1], index: 3, kind: input, shape index: {}]   ;;  %s490_s4 = inlined_call_operand.vmem [shape: bf16[3,32], index: 4, kind: input, shape index: {}]   ;;  %s491_s5 = inlined_call_operand.vmem [shape: f32[3,1], index: 5, kind: input, shape index: {}]   ;;  %s492_s6 = inlined_call_operand.vmem [shape: bf16[4,8], index: 6, kind: input, shape index: {}]   ;;  %s493_s7 = inlined_call_operand.<no memory space> [shape: bf16[], index: 7, kind: input, shape index: {}]   ;;  %s494_s8 = inlined_call_operand.vmem [shape: f32[3,128], index: 8, kind: output, shape index: {}]  }
   0x1   :  { %v13_v0 = vstv %s493_s7 }
   0x2   :  { %v14_v1 = vunpack.i.l.bf16 %v13_v0 }
   0x3   :  { %v38_v2 = vld [vmem:[%s492_s6] sm:$0x3]  ;;  %v41_v3 = vlaneseq  ;;  %vm95_vm0 = vcmask 31744   ;;  %v378_v8 = vmov 0   ;;  %v63_v9 = vld [vmem:[%s487_s1 + $0x10] sm:$0xff]  ;;  %v64_v12 = vld [vmem:[%s487_s1 + $0x18] sm:$0xff] }
   0x4   :  { %v39_v4 = vunpack.c.l.bf16 %v38_v2  ;;  %v370_v5 = vld [vmem:[%s486_s0] sm:$0xff]   ;;  %368 = vset.pattern.permute.xlu0 %v378_v8  ;;  %369 = vset.pattern.permute.xlu1 %v378_v8  ;;  %v62_v13 = vld [vmem:[%s487_s1 + $0x8] sm:$0xff]  ;;  %v379_v15 = vmov 0.0   ;;  %v167_v17 = vld [vmem:[%s489_s3 + $0x10] sm:$0xff]  ;;  %vm102_vm3 = vcmask 1041408   ;;  %vm199_vm4 = vcmask 261120  }
   0x5   :  { %v42_v6 = vshrl.u32 %v41_v3, 7  ;;  %v47_v7 = vand.u32 127, %v41_v3  ;;  %344 = vmatprep.mubr.msk.bf16.mxu0 %vm95_vm0, %v370_v5  ;;  %77 = vperm.xlu0 %368, %v63_v9   ;;  %v61_v10 = vld [vmem:[%s487_s1] sm:$0xff]  ;;  %v168_v18 = vld [vmem:[%s489_s3 + $0x18] sm:$0xff]  ;;  %v166_v20 = vld [vmem:[%s489_s3 + $0x8] sm:$0xff]  ;;  %vm380_vm5 = vmmov 0  }
   0x6   :  { %67 = vperm.xlu1 %369, %v61_v10   ;;  %v165_v19 = vld [vmem:[%s489_s3] sm:$0xff]  ;;  %v371_v23 = vld [vmem:[%s486_s0 + $0x8] sm:$0xff]  }
   0x7   :  { %vm44_vm1 = vcmp.lt.s32.totalorder %v42_v6, 4  ;;  %vm49_vm2 = vcmp.lt.s32.totalorder %v47_v7, 8  ;;  %v262_v24 = vld [vmem:[%s491_s5] sm:$0x7]  ;;  %v373_v44 = vld [vmem:[%s488_s2 + $0x8] sm:$0xff]  }
   0x8   :  { %v45_v11 = vsel %vm44_vm1, %v39_v4, %v14_v1  ;;  %v372_v25 = vld [vmem:[%s488_s2] sm:$0xff]  }
   0x9   :  { %v50_v14 = vsel %vm49_vm2, %v45_v11, %v14_v1  ;;  %82 = vperm.xlu0 %368, %v64_v12   ;;  %352 = vmatprep.mubr.msk.bf16.mxu1 %vm199_vm4, %v372_v25  ;;  %v259_v63 = vld [vmem:[%s490_s4] sm:$0x3] }
   0xa   :  { %v51_v16 = vpack.c.bf16 %v379_v15, %v50_v14  ;;  %72 = vperm.xlu1 %369, %v62_v13  }
   0xc   :  { %54 = vst [vmem:[#allocation7] sm:$0x3] %v51_v16 }
   0xd   :  { %181 = vperm.xlu0 %368, %v167_v17  }
   0xe   :  { %186 = vperm.xlu1 %369, %v168_v18  }
  0x11   :  { %171 = vperm.xlu0 %368, %v165_v19  }
  0x12   :  { %176 = vperm.xlu1 %369, %v166_v20  }
  0x13   :  { %v56_v21 = vld [vmem:[#allocation7] sm:$0x3] }
  0x14   :  { %364 = vmatprep.subr.msk.bf16.mxu0 %vm102_vm3, %v56_v21  ;;  %v104_v22 = vsel %vm102_vm3, %v56_v21, 0 }
  0x15   :  { %343 = vmatpush3.bf16.msra.mxu0 %v104_v22  ;;  %265 = vperm.xlu0 %368, %v262_v24  }
  0x16   :  { %356 = vmatprep.subr.bf16.mxu0 %v379_v15 }
  0x18   :  { %345 = vmatmul.mubr.msk.bf16.vlgmr.msra.gmra.mxu0 %vm95_vm0, %v371_v23 }
  0x19   :  { %360 = vmatprep.mubr.msk.bf16.mxu0 %vm380_vm5, %v379_v15 }
  0x80   :  { %v78_v26 = vpop.permute.xlu0 %77 }
  0x81   :  { %v68_v27 = vpop.permute.xlu1 %67 }
  0x84   :  { %v83_v31 = vpop.permute.xlu0 %82 }
  0x85   :  { %v73_v35 = vpop.permute.xlu1 %72 }
  0x88   :  { %v182_v45 = vpop.permute.xlu0 %181 }
  0x89   :  { %v187_v46 = vpop.permute.xlu1 %186 }
  0x8c   :  { %v172_v51 = vpop.permute.xlu0 %171 }
  0x8d   :  { %v177_v53 = vpop.permute.xlu1 %176 }
  0x90   :  { %v266_v0 = vpop.permute.xlu0 %265 }
  0xd8   :  { %v346_v28 = vpop.f32.mrf.mxu0 }
  0xd9   :  { %v149_v30 = vadd.f32 %v346_v28, %v78_v26 }
  0xda   :  { %v140_v29 = vpop.f32.mrf.mxu0 }
  0xdb   :  { %v141_v33 = vadd.f32 %v140_v29, %v68_v27  ;;  %v157_v37 = vmax.f32 %v149_v30, 0.0 }
  0xdc   :  { %v347_v32 = vpop.f32.mrf.mxu0 }
  0xdd   :  { %v152_v34 = vadd.f32 %v347_v32, %v83_v31  ;;  %v155_v40 = vmax.f32 %v141_v33, 0.0 }
  0xde   :  { %v143_v36 = vpop.f32.mrf.mxu0 }
  0xdf   :  { %v158_v38 = vmax.f32 %v152_v34, 0.0  ;;  %v144_v39 = vadd.f32 %v143_v36, %v73_v35 }
  0xe1   :  { %v156_v41 = vmax.f32 %v144_v39, 0.0  ;;  %v164_v42 = vpack.c.bf16 %v158_v38, %v157_v37 }
  0xe3   :  { %v163_v43 = vpack.c.bf16 %v156_v41, %v155_v40  ;;  %348 = vmatprep.subr.bf16.mxu1 %v164_v42 }
  0xe4   :  { %349 = vmatpush3.bf16.msra.mxu1 %v164_v42 }
  0xe5   :  { %350 = vmatprep.subr.bf16.mxu1 %v163_v43 }
  0xe8   :  { %351 = vmatpush3.bf16.msra.mxu1 %v163_v43 }
  0xeb   :  { %353 = vmatmul.mubr.msk.bf16.vlgmr.msra.gmra.mxu1 %vm199_vm4, %v373_v44 }
 0x1ab   :  { %v354_v47 = vpop.f32.mrf.mxu1 }
 0x1ac   :  { %v249_v49 = vadd.f32 %v354_v47, %v182_v45 }
 0x1ad   :  { %v240_v48 = vpop.f32.mrf.mxu1 }
 0x1ae   :  { %v257_v55 = vmax.f32 %v249_v49, 0.0  ;;  %v241_v56 = vadd.f32 %v240_v48, %v172_v51 }
 0x1af   :  { %v355_v50 = vpop.f32.mrf.mxu1 }
 0x1b0   :  { %v252_v52 = vadd.f32 %v355_v50, %v187_v46  ;;  %v255_v61 = vmax.f32 %v241_v56, 0.0 }
 0x1b1   :  { %v243_v54 = vpop.f32.mrf.mxu1 }
 0x1b2   :  { %v258_v57 = vmax.f32 %v252_v52, 0.0  ;;  %v244_v58 = vadd.f32 %v243_v54, %v177_v53 }
 0x1b4   :  { %v261_v59 = vpack.c.bf16 %v258_v57, %v257_v55  ;;  %v256_v60 = vmax.f32 %v244_v58, 0.0 }
 0x1b6   :  { %357 = vmatpush3.bf16.msra.mxu0 %v261_v59  ;;  %v260_v62 = vpack.c.bf16 %v256_v60, %v255_v61 }
 0x1b7   :  { %358 = vmatprep.subr.bf16.mxu0 %v379_v15 }
 0x1ba   :  { %359 = vmatpush3.bf16.msra.mxu0 %v260_v62 }
 0x1bd   :  { %361 = vmatmul.mubr.msk.bf16.vlgmr.msra.gmra.mxu0 %vm199_vm4, %v259_v63 }
 0x27d   :  { %v305_v1 = vpop.f32.mrf.mxu0 }
 0x27e   :  { %v306_v2 = vadd.f32 %v305_v1, %v266_v0 }
 0x27f   :  { %v362_v3 = vpop.f32.mrf.mxu0 }
 0x280   :  { %v331_v4 = vmul.f32 -1.442695, %v306_v2 }
 0x281   :  { %v308_v5 = vpop.f32.mrf.mxu0 }
 0x282   :  { %374 = vpow2.f32 %v331_v4 }
 0x283   :  { %v363_v6 = vpop.f32.mrf.mxu0 }
 0x28f   :  { %v375_v7 = vpop.eup %374 }
 0x290   :  { %v314_v8 = vadd.f32 1.0, %v375_v7 }
 0x292   :  { %376 = vrcp.f32 %v314_v8 }
 0x29f   :  { %v377_v9 = vpop.eup %376 }
 0x2a0   :  { %317 = vst [vmem:[%s494_s8] sm:$0x7] %v377_v9 }

</bundles_post_ra>
